<compile_context>
chip_gen: v7x
topology: tpu7x:2x2x1
jax: 0.10.0
libtpu: 0.0.40
codegen_flags: <defaults>
</compile_context>

<pallas_src>
import functools

import jax
import jax.numpy as jnp
from jax.experimental import pallas as pl
from jax.experimental.pallas import tpu as pltpu


# ---------------------------------------------------------------------------
# Pallas kernel: one AVWDCRNN layer (full time recurrence) per pallas_call.
# ---------------------------------------------------------------------------
def _avwdcrnn_layer_kernel(x_ref, h0_ref, sup_ref, e_ref,
                           wg_ref, bg_ref, wu_ref, bu_ref,
                           out_ref, h_scr, *, hidden, cheb_k):
    t = pl.program_id(0)

    @pl.when(t == 0)
    def _():
        h_scr[...] = h0_ref[...]

    B = x_ref.shape[0]
    N = x_ref.shape[2]
    D = x_ref.shape[3]
    H = hidden
    K = cheb_k
    ED = e_ref.shape[1]

    x = x_ref[:, 0, :, :]          # (B, N, D)      input at timestep t
    h = h_scr[...]                 # (B, N, H)      carried hidden state
    sup = sup_ref[...]             # ((K-1)*N, N)   non-identity supports, stacked
    e = e_ref[...]                 # (N, ED)        node embeddings

    def mix(v):
        # Graph mixing with all non-identity supports at once:
        #   (B, N, C) -> (B, (K-1)*N, C)       [MXU]
        return jnp.stack(
            [jnp.dot(sup, v[b], preferred_element_type=jnp.float32)
             for b in range(B)], axis=0)

    def gconv(xg, w_r, bias, out_dim):
        # xg:   (B, N, K*C)        mixed inputs, k-major / channel-minor
        # w_r:  (K*C, ED*out_dim)  weight pool, rows (k,c), cols (d,o)
        # bias: (N, out_dim)
        y = jnp.stack(
            [jnp.dot(xg[b], w_r, preferred_element_type=jnp.float32)
             for b in range(B)], axis=0)           # (B, N, ED*out_dim)  [MXU]
        acc = bias[None]                           # (1, N, out_dim)
        for d in range(ED):                        # short embed-dim reduce [VPU]
            acc = acc + e[None, :, d:d + 1] * y[:, :, d * out_dim:(d + 1) * out_dim]
        return acc

    # --- gate path: z and r fused, output width 2H --------------------------
    xin = jnp.concatenate([x, h], axis=-1)         # (B, N, D+H) == k=0 term
    mixed_in = mix(xin)                            # (B, (K-1)*N, D+H)

    cols = [xin]
    for k in range(K - 1):
        cols.append(mixed_in[:, k * N:(k + 1) * N, :])
    xg_gate = jnp.concatenate(cols, axis=-1)       # (B, N, K*(D+H))

    zr = jax.nn.sigmoid(gconv(xg_gate, wg_ref[...], bg_ref[...], 2 * H))
    z = zr[..., :H]
    r = zr[..., H:]

    # --- candidate path: input is concat(x, z*h); reuse sup@x from above ----
    zh = z * h
    mixed_zh = mix(zh)                             # (B, (K-1)*N, H)
    cols = [jnp.concatenate([x, zh], axis=-1)]
    for k in range(K - 1):
        cols.append(jnp.concatenate(
            [mixed_in[:, k * N:(k + 1) * N, :D],
             mixed_zh[:, k * N:(k + 1) * N, :]], axis=-1))
    xg_cand = jnp.concatenate(cols, axis=-1)       # (B, N, K*(D+H))

    hc = jnp.tanh(gconv(xg_cand, wu_ref[...], bu_ref[...], H))

    h_new = r * h + (1.0 - r) * hc
    h_scr[...] = h_new
    out_ref[:, 0, :, :] = h_new.astype(out_ref.dtype)


def make_layer_call(B, T, N, D, H, K, ED):
    """Builds the pallas_call for one AVWDCRNN layer (whole sequence)."""
    kernel = functools.partial(_avwdcrnn_layer_kernel, hidden=H, cheb_k=K)

    def const_spec(shape):
        nd = len(shape)
        return pl.BlockSpec(shape, lambda t, _nd=nd: (0,) * _nd)

    C = D + H
    return pl.pallas_call(
        kernel,
        out_shape=jax.ShapeDtypeStruct((B, T, N, H), jnp.float32),
        grid=(T,),
        in_specs=[
            pl.BlockSpec((B, 1, N, D), lambda t: (0, t, 0, 0)),  # x sequence
            const_spec((B, N, H)),                               # init hidden
            const_spec(((K - 1) * N, N)),                        # supports k>=1
            const_spec((N, ED)),                                 # node embeddings
            const_spec((K * C, ED * 2 * H)),                     # gate weight pool
            const_spec((N, 2 * H)),                              # gate bias
            const_spec((K * C, ED * H)),                         # update weight pool
            const_spec((N, H)),                                  # update bias
        ],
        out_specs=pl.BlockSpec((B, 1, N, H), lambda t: (0, t, 0, 0)),
        scratch_shapes=[pltpu.VMEM((B, N, H), jnp.float32)],     # carried state
        compiler_params=pltpu.CompilerParams(
            dimension_semantics=("arbitrary",)),   # time recurrence is sequential
    )


# ---------------------------------------------------------------------------
# Plain-JAX glue: supports, weight-pool layout, and the per-layer loop.
# ---------------------------------------------------------------------------
def compute_supports(E, cheb_k):
    N = E.shape[0]
    S = jax.nn.softmax(jax.nn.relu(E @ E.T), axis=1)
    sset = [jnp.eye(N, dtype=jnp.float32), S]
    for _ in range(2, cheb_k):
        sset.append(2.0 * S @ sset[-1] - sset[-2])
    return jnp.stack(sset, axis=0)          # (K, N, N)


def init_avwgcn_pools(key, embed_dim, cheb_k, dim_in, dim_out):
    k1, k2 = jax.random.split(key)
    w_pool = 0.1 * jax.random.normal(k1, (embed_dim, cheb_k, dim_in, dim_out),
                                     jnp.float32)
    b_pool = 0.1 * jax.random.normal(k2, (embed_dim, dim_out), jnp.float32)
    return w_pool, b_pool


def _pool_to_kernel_layout(w_pool):
    # (ED, K, C, O) -> (K*C, ED*O); rows k-major/c-minor, cols d-major/o-minor.
    ED, K, C, O = w_pool.shape
    return jnp.transpose(w_pool, (1, 2, 0, 3)).reshape(K * C, ED * O)


def avwdcrnn_forward(x, init_state, node_embeddings, layer_pools, H, cheb_k):
    """Pallas-backed AVWDCRNN forward.  Returns (output_seq, last_hidden_list)."""
    B, T, N, D0 = x.shape
    ED = node_embeddings.shape[1]
    assert cheb_k >= 2, "module semantics require cheb_order >= 2"
    sup = compute_supports(node_embeddings, cheb_k)            # (K, N, N)
    sup_rest = sup[1:].reshape((cheb_k - 1) * N, N)            # identity dropped

    current = x
    output_hidden = []
    dim_in = D0
    for i, ((wg_pool, bg_pool), (wu_pool, bu_pool)) in enumerate(layer_pools):
        wg_r = _pool_to_kernel_layout(wg_pool)                 # (K*(D+H), ED*2H)
        wu_r = _pool_to_kernel_layout(wu_pool)                 # (K*(D+H), ED*H)
        bg = node_embeddings @ bg_pool                         # (N, 2H)
        bu = node_embeddings @ bu_pool                         # (N, H)

        layer = make_layer_call(B, T, N, dim_in, H, cheb_k, ED)
        current = layer(current, init_state[i], sup_rest, node_embeddings,
                        wg_r, bg, wu_r, bu)                    # (B, T, N, H)
        output_hidden.append(current[:, -1])
        dim_in = H
    return current, output_hidden


# ---------------------------------------------------------------------------
# Pure-JAX reference (torch-faithful math) for validation.
# ---------------------------------------------------------------------------
_HI = jax.lax.Precision.HIGHEST


def _gcn_ref(xin, sup, E, w_pool, b_pool):
    W = jnp.einsum('nd,dkio->nkio', E, w_pool, precision=_HI)
    b = E @ b_pool
    x_g = jnp.einsum('knm,bmc->bknc', sup, xin, precision=_HI)
    x_g = jnp.transpose(x_g, (0, 2, 1, 3))
    return jnp.einsum('bnki,nkio->bno', x_g, W, precision=_HI) + b


def _cell_ref(x_t, state, sup, E, gate_pools, update_pools, H):
    inp = jnp.concatenate([x_t, state], axis=-1)
    zr = jax.nn.sigmoid(_gcn_ref(inp, sup, E, *gate_pools))
    z, r = zr[..., :H], zr[..., H:]
    cand = jnp.concatenate([x_t, z * state], axis=-1)
    hc = jnp.tanh(_gcn_ref(cand, sup, E, *update_pools))
    return r * state + (1.0 - r) * hc


def forward_ref(x, init_state, node_embeddings, layer_pools, H, cheb_k):
    B, T, N, _ = x.shape
    sup = compute_supports(node_embeddings, cheb_k)
    current = x
    hiddens = []
    for i, (gate_pools, update_pools) in enumerate(layer_pools):
        state = init_state[i]
        states = []
        for t in range(T):
            state = _cell_ref(current[:, t], state, sup, node_embeddings,
                              gate_pools, update_pools, H)
            states.append(state)
        hiddens.append(state)
        current = jnp.stack(states, axis=1)
    return current, hiddens


# ---------------------------------------------------------------------------
if __name__ == "__main__":
    key = jax.random.PRNGKey(0)
    B, T, N = 2, 4, 8        # batch, seq_len, num_nodes
    D0 = 2                   # feature_used
    H = 16                   # rnn_units (hidden_dim)
    ED = 4                   # embed_dim
    L = 2                    # num_layers
    K = 2                    # cheb_order

    ks = jax.random.split(key, 2 + L)
    x = jax.random.normal(ks[0], (B, T, N, D0), jnp.float32)
    node_embeddings = jax.random.normal(ks[1], (N, ED), jnp.float32)
    init_state = jnp.zeros((L, B, N, H), jnp.float32)   # init_hidden()

    layer_pools = []
    dim_in = D0
    for i in range(L):
        kg, ku = jax.random.split(ks[2 + i])
        layer_pools.append((init_avwgcn_pools(kg, ED, K, dim_in + H, 2 * H),
                            init_avwgcn_pools(ku, ED, K, dim_in + H, H)))
        dim_in = H

    out, hiddens = avwdcrnn_forward(x, init_state, node_embeddings,
                                    layer_pools, H, K)
    out = jax.block_until_ready(out)
    for s in hiddens:
        jax.block_until_ready(s)

    assert out.shape == (B, T, N, H)
    assert len(hiddens) == L and hiddens[0].shape == (B, N, H)

    ref_out, ref_hid = forward_ref(x, init_state, node_embeddings,
                                   layer_pools, H, K)
    ref_out = jax.block_until_ready(ref_out)
    err = float(jnp.max(jnp.abs(out - ref_out)))
    err_h = max(float(jnp.max(jnp.abs(a - b))) for a, b in zip(hiddens, ref_hid))

    # Layout/math bugs show up as O(0.1..1) errors and are caught here; the
    # remaining slack only covers TPU MXU default-precision f32 matmul passes
    # inside the kernel (the pure-JAX reference runs its einsums at HIGHEST).
    # TODO(synk): tighten to ~1e-4 once in-kernel dot precision is pinned.
    if not (err < 2e-2 and err_h < 2e-2):
        raise AssertionError(f"mismatch vs reference: {err} / {err_h}")

    print("KERNEL_OK")
</pallas_src>

<mosaic_0001>
module attributes {stable_mosaic.version = 11 : i64} {
  func.func @_avwdcrnn_layer_kernel(%arg0: i32, %arg1: memref<2x1x8x2xf32, #tpu.memory_space<vmem>>, %arg2: memref<2x8x16xf32, #tpu.memory_space<vmem>>, %arg3: memref<8x8xf32, #tpu.memory_space<vmem>>, %arg4: memref<8x4xf32, #tpu.memory_space<vmem>>, %arg5: memref<36x128xf32, #tpu.memory_space<vmem>>, %arg6: memref<8x32xf32, #tpu.memory_space<vmem>>, %arg7: memref<36x64xf32, #tpu.memory_space<vmem>>, %arg8: memref<8x16xf32, #tpu.memory_space<vmem>>, %arg9: memref<2x1x8x16xf32, #tpu.memory_space<vmem>>, %arg10: memref<2x8x16xf32, #tpu.memory_space<vmem>>) attributes {dimension_semantics = [#tpu.dimension_semantics<arbitrary>], iteration_bounds = array<i64: 4>, scalar_prefetch = 0 : i64, scratch_operands = 1 : i64, tpu.core_type = #tpu.core_type<tc>, window_params = [{transform_indices = @transform_0, window_bounds = array<i64: 2, 1, 8, 2>}, {pipeline_mode = #tpu.pipeline_mode<synchronous>, transform_indices = @transform_1, window_bounds = array<i64: 2, 8, 16>}, {pipeline_mode = #tpu.pipeline_mode<synchronous>, transform_indices = @transform_2, window_bounds = array<i64: 8, 8>}, {pipeline_mode = #tpu.pipeline_mode<synchronous>, transform_indices = @transform_3, window_bounds = array<i64: 8, 4>}, {pipeline_mode = #tpu.pipeline_mode<synchronous>, transform_indices = @transform_4, window_bounds = array<i64: 36, 128>}, {pipeline_mode = #tpu.pipeline_mode<synchronous>, transform_indices = @transform_5, window_bounds = array<i64: 8, 32>}, {pipeline_mode = #tpu.pipeline_mode<synchronous>, transform_indices = @transform_6, window_bounds = array<i64: 36, 64>}, {pipeline_mode = #tpu.pipeline_mode<synchronous>, transform_indices = @transform_7, window_bounds = array<i64: 8, 16>}, {transform_indices = @transform_8, window_bounds = array<i64: 2, 1, 8, 16>}]} {
    %c0_i32 = arith.constant 0 : i32
    %0 = arith.cmpi eq, %arg0, %c0_i32 : i32
    %1 = arith.extui %0 : i1 to i32
    %c0_i32_0 = arith.constant 0 : i32
    %2 = arith.cmpi ne, %1, %c0_i32_0 : i32
    scf.if %2 {
      %c0_35 = arith.constant 0 : index
      %c0_36 = arith.constant 0 : index
      %c0_37 = arith.constant 0 : index
      %124 = vector.load %arg2[%c0_35, %c0_36, %c0_37] : memref<2x8x16xf32, #tpu.memory_space<vmem>>, vector<2x8x16xf32>
      %c0_38 = arith.constant 0 : index
      %c0_39 = arith.constant 0 : index
      %c0_40 = arith.constant 0 : index
      %125 = vector.load %arg10[%c0_38, %c0_39, %c0_40] : memref<2x8x16xf32, #tpu.memory_space<vmem>>, vector<2x8x16xf32>
      tpu.vector_store %arg10[%c0_38, %c0_39, %c0_40], %124 {strides = array<i32>} : memref<2x8x16xf32, #tpu.memory_space<vmem>>, vector<2x8x16xf32>,
    } else {
    }
    %c0 = arith.constant 0 : index
    %c0_1 = arith.constant 0 : index
    %c0_2 = arith.constant 0 : index
    %c0_3 = arith.constant 0 : index
    %3 = vector.load %arg1[%c0, %c0_1, %c0_2, %c0_3] : memref<2x1x8x2xf32, #tpu.memory_space<vmem>>, vector<2x1x8x2xf32>
    %4 = vector.shape_cast %3 : vector<2x1x8x2xf32> to vector<2x8x2xf32>
    %c0_4 = arith.constant 0 : index
    %c0_5 = arith.constant 0 : index
    %c0_6 = arith.constant 0 : index
    %5 = vector.load %arg10[%c0_4, %c0_5, %c0_6] : memref<2x8x16xf32, #tpu.memory_space<vmem>>, vector<2x8x16xf32>
    %c0_7 = arith.constant 0 : index
    %c0_8 = arith.constant 0 : index
    %6 = vector.load %arg3[%c0_7, %c0_8] : memref<8x8xf32, #tpu.memory_space<vmem>>, vector<8x8xf32>
    %c0_9 = arith.constant 0 : index
    %c0_10 = arith.constant 0 : index
    %7 = vector.load %arg4[%c0_9, %c0_10] : memref<8x4xf32, #tpu.memory_space<vmem>>, vector<8x4xf32>
    %8 = tpu.concatenate %4, %5 in 2 : vector<2x8x2xf32>, vector<2x8x16xf32> -> vector<2x8x18xf32>
    %9 = vector.extract_strided_slice %8 {offsets = [0, 0, 0], sizes = [1, 8, 18], strides = [1, 1, 1]} : vector<2x8x18xf32> to vector<1x8x18xf32>
    %10 = vector.shape_cast %9 : vector<1x8x18xf32> to vector<8x18xf32>
    %cst = arith.constant dense<0.000000e+00> : vector<8x18xf32>
    %11 = tpu.matmul %6, %10, %cst {dimension_numbers = #tpu.dot_dimension_numbers<[1], [0], [0], [1], [0, 0, 1, 1], [], []>} : vector<8x8xf32>, vector<8x18xf32>, vector<8x18xf32> -> vector<8x18xf32>
    %12 = vector.extract_strided_slice %8 {offsets = [1, 0, 0], sizes = [1, 8, 18], strides = [1, 1, 1]} : vector<2x8x18xf32> to vector<1x8x18xf32>
    %13 = vector.shape_cast %12 : vector<1x8x18xf32> to vector<8x18xf32>
    %cst_11 = arith.constant dense<0.000000e+00> : vector<8x18xf32>
    %14 = tpu.matmul %6, %13, %cst_11 {dimension_numbers = #tpu.dot_dimension_numbers<[1], [0], [0], [1], [0, 0, 1, 1], [], []>} : vector<8x8xf32>, vector<8x18xf32>, vector<8x18xf32> -> vector<8x18xf32>
    %15 = vector.shape_cast %11 : vector<8x18xf32> to vector<1x8x18xf32>
    %16 = vector.shape_cast %14 : vector<8x18xf32> to vector<1x8x18xf32>
    %17 = tpu.concatenate %15, %16 in 0 : vector<1x8x18xf32>, vector<1x8x18xf32> -> vector<2x8x18xf32>
    %18 = tpu.concatenate %8, %17 in 2 : vector<2x8x18xf32>, vector<2x8x18xf32> -> vector<2x8x36xf32>
    %c0_12 = arith.constant 0 : index
    %c0_13 = arith.constant 0 : index
    %19 = vector.load %arg5[%c0_12, %c0_13] : memref<36x128xf32, #tpu.memory_space<vmem>>, vector<36x128xf32>
    %c0_14 = arith.constant 0 : index
    %c0_15 = arith.constant 0 : index
    %20 = vector.load %arg6[%c0_14, %c0_15] : memref<8x32xf32, #tpu.memory_space<vmem>>, vector<8x32xf32>
    %21 = vector.extract_strided_slice %18 {offsets = [0, 0, 0], sizes = [1, 8, 36], strides = [1, 1, 1]} : vector<2x8x36xf32> to vector<1x8x36xf32>
    %22 = vector.shape_cast %21 : vector<1x8x36xf32> to vector<8x36xf32>
    %cst_16 = arith.constant dense<0.000000e+00> : vector<8x128xf32>
    %23 = tpu.matmul %22, %19, %cst_16 {dimension_numbers = #tpu.dot_dimension_numbers<[1], [0], [0], [1], [0, 0, 1, 1], [], []>} : vector<8x36xf32>, vector<36x128xf32>, vector<8x128xf32> -> vector<8x128xf32>
    %24 = vector.extract_strided_slice %18 {offsets = [1, 0, 0], sizes = [1, 8, 36], strides = [1, 1, 1]} : vector<2x8x36xf32> to vector<1x8x36xf32>
    %25 = vector.shape_cast %24 : vector<1x8x36xf32> to vector<8x36xf32>
    %cst_17 = arith.constant dense<0.000000e+00> : vector<8x128xf32>
    %26 = tpu.matmul %25, %19, %cst_17 {dimension_numbers = #tpu.dot_dimension_numbers<[1], [0], [0], [1], [0, 0, 1, 1], [], []>} : vector<8x36xf32>, vector<36x128xf32>, vector<8x128xf32> -> vector<8x128xf32>
    %27 = vector.shape_cast %23 : vector<8x128xf32> to vector<1x8x128xf32>
    %28 = vector.shape_cast %26 : vector<8x128xf32> to vector<1x8x128xf32>
    %29 = tpu.concatenate %27, %28 in 0 : vector<1x8x128xf32>, vector<1x8x128xf32> -> vector<2x8x128xf32>
    %30 = vector.shape_cast %20 : vector<8x32xf32> to vector<1x8x32xf32>
    %31 = vector.extract_strided_slice %7 {offsets = [0, 0], sizes = [8, 1], strides = [1, 1]} : vector<8x4xf32> to vector<8x1xf32>
    %32 = vector.shape_cast %31 : vector<8x1xf32> to vector<1x8x1xf32>
    %33 = vector.extract_strided_slice %29 {offsets = [0, 0, 0], sizes = [2, 8, 32], strides = [1, 1, 1]} : vector<2x8x128xf32> to vector<2x8x32xf32>
    %34 = vector.broadcast %32 : vector<1x8x1xf32> to vector<2x8x32xf32>
    %35 = arith.mulf %34, %33 : vector<2x8x32xf32>
    %36 = vector.broadcast %30 : vector<1x8x32xf32> to vector<2x8x32xf32>
    %37 = arith.addf %36, %35 : vector<2x8x32xf32>
    %38 = vector.extract_strided_slice %7 {offsets = [0, 1], sizes = [8, 1], strides = [1, 1]} : vector<8x4xf32> to vector<8x1xf32>
    %39 = vector.shape_cast %38 : vector<8x1xf32> to vector<1x8x1xf32>
    %40 = vector.extract_strided_slice %29 {offsets = [0, 0, 32], sizes = [2, 8, 32], strides = [1, 1, 1]} : vector<2x8x128xf32> to vector<2x8x32xf32>
    %41 = vector.broadcast %39 : vector<1x8x1xf32> to vector<2x8x32xf32>
    %42 = arith.mulf %41, %40 : vector<2x8x32xf32>
    %43 = arith.addf %37, %42 : vector<2x8x32xf32>
    %44 = vector.extract_strided_slice %7 {offsets = [0, 2], sizes = [8, 1], strides = [1, 1]} : vector<8x4xf32> to vector<8x1xf32>
    %45 = vector.shape_cast %44 : vector<8x1xf32> to vector<1x8x1xf32>
    %46 = vector.extract_strided_slice %29 {offsets = [0, 0, 64], sizes = [2, 8, 32], strides = [1, 1, 1]} : vector<2x8x128xf32> to vector<2x8x32xf32>
    %47 = vector.broadcast %45 : vector<1x8x1xf32> to vector<2x8x32xf32>
    %48 = arith.mulf %47, %46 : vector<2x8x32xf32>
    %49 = arith.addf %43, %48 : vector<2x8x32xf32>
    %50 = vector.extract_strided_slice %7 {offsets = [0, 3], sizes = [8, 1], strides = [1, 1]} : vector<8x4xf32> to vector<8x1xf32>
    %51 = vector.shape_cast %50 : vector<8x1xf32> to vector<1x8x1xf32>
    %52 = vector.extract_strided_slice %29 {offsets = [0, 0, 96], sizes = [2, 8, 32], strides = [1, 1, 1]} : vector<2x8x128xf32> to vector<2x8x32xf32>
    %53 = vector.broadcast %51 : vector<1x8x1xf32> to vector<2x8x32xf32>
    %54 = arith.mulf %53, %52 : vector<2x8x32xf32>
    %55 = arith.addf %49, %54 : vector<2x8x32xf32>
    %56 = arith.negf %55 : vector<2x8x32xf32>
    %57 = math.exp %56 : vector<2x8x32xf32>
    %cst_18 = arith.constant 1.000000e+00 : f32
    %58 = vector.broadcast %cst_18 : f32 to vector<2x8x32xf32>
    %59 = arith.addf %58, %57 : vector<2x8x32xf32>
    %60 = arith.divf %58, %59 : vector<2x8x32xf32>
    %61 = vector.extract_strided_slice %60 {offsets = [0, 0, 0], sizes = [2, 8, 16], strides = [1, 1, 1]} : vector<2x8x32xf32> to vector<2x8x16xf32>
    %62 = vector.extract_strided_slice %60 {offsets = [0, 0, 16], sizes = [2, 8, 16], strides = [1, 1, 1]} : vector<2x8x32xf32> to vector<2x8x16xf32>
    %63 = arith.mulf %61, %5 : vector<2x8x16xf32>
    %64 = vector.extract_strided_slice %63 {offsets = [0, 0, 0], sizes = [1, 8, 16], strides = [1, 1, 1]} : vector<2x8x16xf32> to vector<1x8x16xf32>
    %65 = vector.shape_cast %64 : vector<1x8x16xf32> to vector<8x16xf32>
    %cst_19 = arith.constant dense<0.000000e+00> : vector<8x16xf32>
    %66 = tpu.matmul %6, %65, %cst_19 {dimension_numbers = #tpu.dot_dimension_numbers<[1], [0], [0], [1], [0, 0, 1, 1], [], []>} : vector<8x8xf32>, vector<8x16xf32>, vector<8x16xf32> -> vector<8x16xf32>
    %67 = vector.extract_strided_slice %63 {offsets = [1, 0, 0], sizes = [1, 8, 16], strides = [1, 1, 1]} : vector<2x8x16xf32> to vector<1x8x16xf32>
    %68 = vector.shape_cast %67 : vector<1x8x16xf32> to vector<8x16xf32>
    %cst_20 = arith.constant dense<0.000000e+00> : vector<8x16xf32>
    %69 = tpu.matmul %6, %68, %cst_20 {dimension_numbers = #tpu.dot_dimension_numbers<[1], [0], [0], [1], [0, 0, 1, 1], [], []>} : vector<8x8xf32>, vector<8x16xf32>, vector<8x16xf32> -> vector<8x16xf32>
    %70 = vector.shape_cast %66 : vector<8x16xf32> to vector<1x8x16xf32>
    %71 = vector.shape_cast %69 : vector<8x16xf32> to vector<1x8x16xf32>
    %72 = tpu.concatenate %70, %71 in 0 : vector<1x8x16xf32>, vector<1x8x16xf32> -> vector<2x8x16xf32>
    %73 = tpu.concatenate %4, %63 in 2 : vector<2x8x2xf32>, vector<2x8x16xf32> -> vector<2x8x18xf32>
    %74 = vector.extract_strided_slice %17 {offsets = [0, 0, 0], sizes = [2, 8, 2], strides = [1, 1, 1]} : vector<2x8x18xf32> to vector<2x8x2xf32>
    %75 = tpu.concatenate %74, %72 in 2 : vector<2x8x2xf32>, vector<2x8x16xf32> -> vector<2x8x18xf32>
    %76 = tpu.concatenate %73, %75 in 2 : vector<2x8x18xf32>, vector<2x8x18xf32> -> vector<2x8x36xf32>
    %c0_21 = arith.constant 0 : index
    %c0_22 = arith.constant 0 : index
    %77 = vector.load %arg7[%c0_21, %c0_22] : memref<36x64xf32, #tpu.memory_space<vmem>>, vector<36x64xf32>
    %c0_23 = arith.constant 0 : index
    %c0_24 = arith.constant 0 : index
    %78 = vector.load %arg8[%c0_23, %c0_24] : memref<8x16xf32, #tpu.memory_space<vmem>>, vector<8x16xf32>
    %79 = vector.extract_strided_slice %76 {offsets = [0, 0, 0], sizes = [1, 8, 36], strides = [1, 1, 1]} : vector<2x8x36xf32> to vector<1x8x36xf32>
    %80 = vector.shape_cast %79 : vector<1x8x36xf32> to vector<8x36xf32>
    %cst_25 = arith.constant dense<0.000000e+00> : vector<8x64xf32>
    %81 = tpu.matmul %80, %77, %cst_25 {dimension_numbers = #tpu.dot_dimension_numbers<[1], [0], [0], [1], [0, 0, 1, 1], [], []>} : vector<8x36xf32>, vector<36x64xf32>, vector<8x64xf32> -> vector<8x64xf32>
    %82 = vector.extract_strided_slice %76 {offsets = [1, 0, 0], sizes = [1, 8, 36], strides = [1, 1, 1]} : vector<2x8x36xf32> to vector<1x8x36xf32>
    %83 = vector.shape_cast %82 : vector<1x8x36xf32> to vector<8x36xf32>
    %cst_26 = arith.constant dense<0.000000e+00> : vector<8x64xf32>
    %84 = tpu.matmul %83, %77, %cst_26 {dimension_numbers = #tpu.dot_dimension_numbers<[1], [0], [0], [1], [0, 0, 1, 1], [], []>} : vector<8x36xf32>, vector<36x64xf32>, vector<8x64xf32> -> vector<8x64xf32>
    %85 = vector.shape_cast %81 : vector<8x64xf32> to vector<1x8x64xf32>
    %86 = vector.shape_cast %84 : vector<8x64xf32> to vector<1x8x64xf32>
    %87 = tpu.concatenate %85, %86 in 0 : vector<1x8x64xf32>, vector<1x8x64xf32> -> vector<2x8x64xf32>
    %88 = vector.shape_cast %78 : vector<8x16xf32> to vector<1x8x16xf32>
    %89 = vector.extract_strided_slice %7 {offsets = [0, 0], sizes = [8, 1], strides = [1, 1]} : vector<8x4xf32> to vector<8x1xf32>
    %90 = vector.shape_cast %89 : vector<8x1xf32> to vector<1x8x1xf32>
    %91 = vector.extract_strided_slice %87 {offsets = [0, 0, 0], sizes = [2, 8, 16], strides = [1, 1, 1]} : vector<2x8x64xf32> to vector<2x8x16xf32>
    %92 = vector.broadcast %90 : vector<1x8x1xf32> to vector<2x8x16xf32>
    %93 = arith.mulf %92, %91 : vector<2x8x16xf32>
    %94 = vector.broadcast %88 : vector<1x8x16xf32> to vector<2x8x16xf32>
    %95 = arith.addf %94, %93 : vector<2x8x16xf32>
    %96 = vector.extract_strided_slice %7 {offsets = [0, 1], sizes = [8, 1], strides = [1, 1]} : vector<8x4xf32> to vector<8x1xf32>
    %97 = vector.shape_cast %96 : vector<8x1xf32> to vector<1x8x1xf32>
    %98 = vector.extract_strided_slice %87 {offsets = [0, 0, 16], sizes = [2, 8, 16], strides = [1, 1, 1]} : vector<2x8x64xf32> to vector<2x8x16xf32>
    %99 = vector.broadcast %97 : vector<1x8x1xf32> to vector<2x8x16xf32>
    %100 = arith.mulf %99, %98 : vector<2x8x16xf32>
    %101 = arith.addf %95, %100 : vector<2x8x16xf32>
    %102 = vector.extract_strided_slice %7 {offsets = [0, 2], sizes = [8, 1], strides = [1, 1]} : vector<8x4xf32> to vector<8x1xf32>
    %103 = vector.shape_cast %102 : vector<8x1xf32> to vector<1x8x1xf32>
    %104 = vector.extract_strided_slice %87 {offsets = [0, 0, 32], sizes = [2, 8, 16], strides = [1, 1, 1]} : vector<2x8x64xf32> to vector<2x8x16xf32>
    %105 = vector.broadcast %103 : vector<1x8x1xf32> to vector<2x8x16xf32>
    %106 = arith.mulf %105, %104 : vector<2x8x16xf32>
    %107 = arith.addf %101, %106 : vector<2x8x16xf32>
    %108 = vector.extract_strided_slice %7 {offsets = [0, 3], sizes = [8, 1], strides = [1, 1]} : vector<8x4xf32> to vector<8x1xf32>
    %109 = vector.shape_cast %108 : vector<8x1xf32> to vector<1x8x1xf32>
    %110 = vector.extract_strided_slice %87 {offsets = [0, 0, 48], sizes = [2, 8, 16], strides = [1, 1, 1]} : vector<2x8x64xf32> to vector<2x8x16xf32>
    %111 = vector.broadcast %109 : vector<1x8x1xf32> to vector<2x8x16xf32>
    %112 = arith.mulf %111, %110 : vector<2x8x16xf32>
    %113 = arith.addf %107, %112 : vector<2x8x16xf32>
    %114 = math.tanh %113 : vector<2x8x16xf32>
    %115 = arith.mulf %62, %5 : vector<2x8x16xf32>
    %cst_27 = arith.constant 1.000000e+00 : f32
    %116 = vector.broadcast %cst_27 : f32 to vector<2x8x16xf32>
    %117 = arith.subf %116, %62 : vector<2x8x16xf32>
    %118 = arith.mulf %117, %114 : vector<2x8x16xf32>
    %119 = arith.addf %115, %118 : vector<2x8x16xf32>
    %c0_28 = arith.constant 0 : index
    %c0_29 = arith.constant 0 : index
    %c0_30 = arith.constant 0 : index
    %120 = vector.load %arg10[%c0_28, %c0_29, %c0_30] : memref<2x8x16xf32, #tpu.memory_space<vmem>>, vector<2x8x16xf32>
    tpu.vector_store %arg10[%c0_28, %c0_29, %c0_30], %119 {strides = array<i32>} : memref<2x8x16xf32, #tpu.memory_space<vmem>>, vector<2x8x16xf32>,
    %c0_31 = arith.constant 0 : index
    %c0_32 = arith.constant 0 : index
    %c0_33 = arith.constant 0 : index
    %c0_34 = arith.constant 0 : index
    %121 = vector.load %arg9[%c0_31, %c0_32, %c0_33, %c0_34] : memref<2x1x8x16xf32, #tpu.memory_space<vmem>>, vector<2x1x8x16xf32>
    %122 = vector.shape_cast %121 : vector<2x1x8x16xf32> to vector<2x8x16xf32>
    %123 = vector.shape_cast %119 : vector<2x8x16xf32> to vector<2x1x8x16xf32>
    tpu.vector_store %arg9[%c0_31, %c0_32, %c0_33, %c0_34], %123 {strides = array<i32>} : memref<2x1x8x16xf32, #tpu.memory_space<vmem>>, vector<2x1x8x16xf32>,
    return
  }
  func.func @transform_0(%arg0: i32) -> (i32, i32, i32, i32) {
    %c0_i32 = arith.constant 0 : i32
    %c0_i32_0 = arith.constant 0 : i32
    %c0_i32_1 = arith.constant 0 : i32
    %c0_i32_2 = arith.constant 0 : i32
    return %c0_i32, %arg0, %c0_i32_0, %c0_i32_1 : i32, i32, i32, i32
  }
  func.func @transform_1(%arg0: i32) -> (i32, i32, i32) {
    %c0_i32 = arith.constant 0 : i32
    %c0_i32_0 = arith.constant 0 : i32
    %c0_i32_1 = arith.constant 0 : i32
    %c0_i32_2 = arith.constant 0 : i32
    return %c0_i32, %c0_i32_0, %c0_i32_1 : i32, i32, i32
  }
  func.func @transform_2(%arg0: i32) -> (i32, i32) {
    %c0_i32 = arith.constant 0 : i32
    %c0_i32_0 = arith.constant 0 : i32
    %c0_i32_1 = arith.constant 0 : i32
    return %c0_i32, %c0_i32_0 : i32, i32
  }
  func.func @transform_3(%arg0: i32) -> (i32, i32) {
    %c0_i32 = arith.constant 0 : i32
    %c0_i32_0 = arith.constant 0 : i32
    %c0_i32_1 = arith.constant 0 : i32
    return %c0_i32, %c0_i32_0 : i32, i32
  }
  func.func @transform_4(%arg0: i32) -> (i32, i32) {
    %c0_i32 = arith.constant 0 : i32
    %c0_i32_0 = arith.constant 0 : i32
    %c0_i32_1 = arith.constant 0 : i32
    return %c0_i32, %c0_i32_0 : i32, i32
  }
  func.func @transform_5(%arg0: i32) -> (i32, i32) {
    %c0_i32 = arith.constant 0 : i32
    %c0_i32_0 = arith.constant 0 : i32
    %c0_i32_1 = arith.constant 0 : i32
    return %c0_i32, %c0_i32_0 : i32, i32
  }
  func.func @transform_6(%arg0: i32) -> (i32, i32) {
    %c0_i32 = arith.constant 0 : i32
    %c0_i32_0 = arith.constant 0 : i32
    %c0_i32_1 = arith.constant 0 : i32
    return %c0_i32, %c0_i32_0 : i32, i32
  }
  func.func @transform_7(%arg0: i32) -> (i32, i32) {
    %c0_i32 = arith.constant 0 : i32
    %c0_i32_0 = arith.constant 0 : i32
    %c0_i32_1 = arith.constant 0 : i32
    return %c0_i32, %c0_i32_0 : i32, i32
  }
  func.func @transform_8(%arg0: i32) -> (i32, i32, i32, i32) {
    %c0_i32 = arith.constant 0 : i32
    %c0_i32_0 = arith.constant 0 : i32
    %c0_i32_1 = arith.constant 0 : i32
    %c0_i32_2 = arith.constant 0 : i32
    return %c0_i32, %arg0, %c0_i32_0, %c0_i32_1 : i32, i32, i32, i32
  }
}

</mosaic_0001>

<bundles_post_ra>
// kernel: tpu_custom_call.1
= control target key start
LH: loop header
LB: loop body
LE: loop exit
PB: predicated region body
PF: predicated region fallthrough
CT: control target
= control target key end

     0   :  { %13 = vsyncpa [#allocation5], 0  ;;  %s2010_s0 = inlined_call_operand.vmem [shape: f32[2,4,8,2], index: 0, kind: input, shape index: {}]   ;;  %s2011_s1 = inlined_call_operand.hbm [shape: f32[2,8,16], index: 1, kind: input, shape index: {}]   ;;  %s2012_s2 = inlined_call_operand.vmem [shape: f32[8,8], index: 2, kind: input, shape index: {}]   ;;  %s2013_s3 = inlined_call_operand.vmem [shape: f32[8,4], index: 3, kind: input, shape index: {}]   ;;  %s2014_s4 = inlined_call_operand.vmem [shape: f32[36,128], index: 4, kind: input, shape index: {}]   ;;  %s2015_s5 = inlined_call_operand.vmem [shape: f32[8,32], index: 5, kind: input, shape index: {}]   ;;  %s2016_s6 = inlined_call_operand.vmem [shape: f32[36,64], index: 6, kind: input, shape index: {}]   ;;  %s2017_s7 = inlined_call_operand.vmem [shape: f32[8,16], index: 7, kind: input, shape index: {}]   ;;  %s2018_s8 = inlined_call_operand.hbm [shape: f32[2,4,8,16], index: 8, kind: output, shape index: {}]  }
   0x1   :  { %14 = vsyncpa [#allocation6], 0 }
   0x2   :  { %16 = vsyncpa [#allocation6 + $0x1], 0  ;;  %s1668_s27 = smov 0   ;;  %s1670_s28 = smov 0  }
   0x3   :  { %s1672_s29 = smov 0   ;;  %s1674_s30 = smov 0  }
   0x4 LB: > { %s1689_s9 = sadd.s32 4294967295, %s1599_s30   ;;  %s1261_s10 = sadd.s32 4294967294, %s1599_s30   ;;  %s1599_s30 = sphi %s1674_s30, %s2039_s30   ;;  %s1595_s29 = sphi %s1672_s29, %s2038_s29   ;;  %s1591_s28 = sphi %s1670_s28, %s2037_s28   ;;  %s1587_s27 = sphi %s1668_s27, %s2036_s27  }
   0x5   : > { %s1693_s11 = sadd.s32 1, %s1599_s30   ;;  %s29_s12 = sadd.s32 1, %s1595_s29 }
   0x6   : > { %s26_s13 = ssub.s32 %s1599_s30, %s1693_s11  ;;  %p36_p0 = scmp.ne.s32.totalorder %s1595_s29, %s1591_s28 }
   0x7   : > { %p27_p1 = scmp.eq.s32.totalorder %s26_s13, 0  ;;  %p37_p2 = scmp.eq.s32.totalorder %s1599_s30, 0 }
   0x8   : > { %p213_p3 = scmp.eq.s32.totalorder %s1689_s9, 3  ;;  %p218_p4 = scmp.ne.s32.totalorder %s1591_s28, %s1587_s27 }
   0x9   : > { %s1705_s14 = scalar_select %p27_p1, %s1595_s29, %s29_s12  }
   0xa   : > { %p1707_p5 = por %p37_p2, %p36_p0  ;;  %p1711_p6 = por %p213_p3, %p36_p0 }
   0xb   : > { %2022 = sst [smem:[#allocation10_spill]] %s1705_s14  ;;  %p219_p7 = scmp.eq.s32.totalorder %s1261_s10, 3 }
   0xc   : > { %s2023_s15 = scalar_select %p1707_p5, 1, 0 }
   0xd   : > { %s2024_s16 = scalar_select %p1711_p6, 1, 0 }
   0xe   : > { %p1262_p8 = scmp.ge.s32.totalorder %s1599_s30, 1  ;;  %p226_p9 = scmp.lt.s32.totalorder %s1599_s30, 5 }
   0xf   : > { %p1718_p11 = por %p219_p7, %p218_p4  ;;  %p2019_p12 = scmp.eq.s32.totalorder %s1689_s9, 0 }
  0x10   : > { %p1723_p13 = pnand %p1262_p8, %p226_p9  ;;  %s1601_s19 = smov [#allocation4]  }
  0x11   : > { %s2025_s17 = scalar_select %p1718_p11, 1, 0 }
  0x12   : > { %s2026_s18 = scalar_select %p1723_p13, 1, 0 }
  0x13   : > { %s238_s20 = sshll.u32 %s1601_s19, 4  ;;  %p1424_p0 = pneg %p1723_p13  ;;  %s239_s20 = int_to_ptr.vmem [resolvable:$true] %s238_s20 }
  0x14   : > { %s1505_s24 = scalar_lea.hbm %s2011_s1, 256 }
  0x15   : > { %p1731_p1 = pnand %p2019_p12, %p1424_p0  ;;  %p1506_p2 = scmp.ne.s32.totalorder %s2011_s1, %s1505_s24 }
  0x16   : > { %p1512_p8 = scmp.lt.u32.totalorder %s1505_s24, %s2011_s1 }
  0x17   : > { %p1507_p3 = pneg %p1731_p1 }
  0x19   : > { %p1508_p4 = pnand %p1507_p3, %p1506_p2 }
  0x1b   : > { %p1509_p7 = pneg %p1508_p4 }
  0x1d   : > { %p1514_p9 = pnand %p1512_p8, %p1509_p7 }
  0x1f   : > { %1517 = shalt.err (!%p1514_p9)
}
  0x20   : > { %s1518_s13 = scalar_lea.vmem %s239_s20, 256  ;;  %p1526_p11 = scmp.lt.s32.totalorder %s239_s20, %s239_s20 }
  0x21   : > { %p1519_p0 = scmp.ne.s32.totalorder %s239_s20, %s1518_s13  ;;  %p1527_p6 = scmp.lt.s32.totalorder %s1518_s13, %s1518_s13 }
  0x23   : > { %p1521_p10 = pnand %p1519_p0, %p1507_p3  ;;  %p1528_p13 = por %p1527_p6, %p1526_p11 }
  0x25   : > { %p1522_p12 = pneg %p1521_p10 }
  0x27   : > { %p1529_p5 = pnand %p1528_p13, %p1522_p12 }
  0x29   : > { %1532 = shalt.err (!%p1529_p5)
}
  0x2a   : > { %s1602_s19 = smov 128   ;;  %s1603_s22 = smov 8  }
  0x2b   : > { %1427 = dma.hbm_to_vmem [thread:$0]  (!%p1731_p1), %s2011_s1, 256, %s239_s20, [#allocation5], %s1602_s19, %s1602_s19, %s1603_s22  }
  0x2c   : > { %p1264_p2 = scmp.ge.s32.totalorder %s1599_s30, 4 }
  0x2d   : > { %p2028_p4 = scmp.ne.s32.totalorder (!%p1264_p2), %s2023_s15, 0 }
  0x2e   : > { %266 = sbr.rel (%p1264_p2) target bundleno = 60 (0x3c), region = 44 }
  0x35   : > { %269 = sbr.rel (!%p2028_p4) target bundleno = 60 (0x3c), region = 48  ;;  %s271_s24 = sand.u32 (%p2028_p4), 1, %s1595_s29  }
  0x36   : > { %s1266_s26 = sshll.u32 (%p2028_p4), %s1599_s30, 3  ;;  %s1265_s10 = sshll.u32 (%p2028_p4), %s271_s24, 4 }
  0x37   : > { %s275_s14 = scalar_lea.vmem (%p2028_p4), %s2010_s0, %s1266_s26  ;;  %s273_s21 = scalar_lea.vmem (%p2028_p4), [#allocation3], %s1265_s10 }
  0x38   : > { %v305_v0 = vld [vmem:[%s275_s14] sm:$0xff] (%p2028_p4) }
  0x39   : > { %v307_v1 = vld [vmem:[%s275_s14 + $0x20] sm:$0xff] (%p2028_p4)  ;;  %306 = vst [vmem:[%s273_s21] sm:$0xff] (%p2028_p4), %v305_v0 }
  0x3a   : > { %308 = vst [vmem:[%s273_s21 + $0x8] sm:$0xff] (%p2028_p4), %v307_v1 }
  0x3c PF: > { %p2029_p5 = scmp.ne.s32.totalorder %s2026_s18, 0 }
  0x3d   : > { %s320_s15 = sand.u32 (!%p2029_p5), 1, %s1591_s28   ;;  %p2030_p6 = scmp.eq.s32.totalorder (!%p2029_p5), %s1689_s9, 0 }
  0x3e   : > { %317 = sbr.rel (%p2029_p5) target bundleno = 1941 (0x795), region = 86  ;;  %s1764_s20 = sshll.u32 (!%p2029_p5), %s320_s15, 4 }
  0x3f   : > { %s322_s19 = scalar_lea.vmem (!%p2029_p5), [#allocation3], %s1764_s20 }
  0x45   : > { %1578 = dma.done.wait (%p2030_p6), [#allocation5], 256   ;;  %p2031_p10 = pmov %p2030_p6 }
  0x46   : > { %s1772_s14 = scalar_lea.vmem [#allocation7], %s1764_s20  ;;  %p2032_p11 = scmp.ne.s32.totalorder %s1689_s9, 0 }
  0x47   : > { %1580 = vsyncadd (%p2031_p10), [#allocation5], 4294967040  ;;  %v361_v2 = vld [vmem:[#allocation4] sm:$0xff] (!%p2032_p11)  ;;  %vm363_vm0 = vcmask (!%p2032_p11), 130048   ;;  %v362_v3 = vld [vmem:[#allocation4 + $0x8] sm:$0xff] (!%p2032_p11) }
  0x48   : > { %360 = sbr.rel (%p2032_p11) target bundleno = 79 (0x4f), region = 98  ;;  %364 = vst.msk [vmem:[#allocation2] sm:$0xff] (!%p2032_p11), %vm363_vm0, %v361_v2  ;;  %365 = vst.msk [vmem:[#allocation2 + $0x8] sm:$0xff] (!%p2032_p11), %vm363_vm0, %v362_v3 }
  0x4f PF: > { %v1776_v4 = vld [vmem:[#allocation2] sm:$0xff]  ;;  %s1604_s18 = smov 2   ;;  %v1605_v5 = vmov 0.0   ;;  %v1781_v6 = vld [vmem:[#allocation2 + $0x8] sm:$0xff]  ;;  %vm1606_vm1 = vmmov 0   ;;  %vm380_vm2 = vcmask 15360  }
  0x50   : > { %374 = vrot.lane.b32.xlu0 %v1776_v4, %s1604_s18  ;;  %1322 = vmatprep.subr.mxu0 %v1605_v5  ;;  %v1790_v7 = vld [vmem:[%s322_s19] sm:$0xff]  ;;  %vm383_vm3 = vcmask 64512   ;;  %v1799_v11 = vld [vmem:[%s322_s19 + $0x8] sm:$0xff]  ;;  %v1607_v17 = vmov 0.0|0.0   ;;  %vm548_vm4 = vcmask 1043456   ;;  %v1608_v23 = vmov 2  }
  0x51   : > { %1324 = vmatprep.mubr.msk.f32.mxu0 %vm1606_vm1, %v1605_v5  ;;  %1327 = vmatprep.subr.mxu1 %v1605_v5  ;;  %v1795_v9 = vld [vmem:[%s2012_s2] sm:$0xff]  ;;  %v539_v15 = vld [vmem:[%s2014_s4 + $0x8] sm:$0xff]  ;;  %v540_v16 = vld [vmem:[%s2014_s4 + $0x10] sm:$0xff]  ;;  %v1609_v24 = vmov 1   ;;  %v1610_v25 = vmov 0   ;;  %s1611_s24 = smov 18  }
  0x52   : > { %1329 = vmatprep.mubr.msk.f32.mxu1 %vm1606_vm1, %v1605_v5  ;;  %v538_v14 = vld [vmem:[%s2014_s4] sm:$0xff]  ;;  %v541_v19 = vld [vmem:[%s2014_s4 + $0x18] sm:$0xff]  ;;  %1489 = vset.pattern.permute.xlu1 %v1608_v23  ;;  %v1612_v29 = vmov 3   ;;  %vm535_vm5 = vcmask 146432   ;;  %vm544_vm6 = vcmask 293888   ;;  %s1613_s26 = smov 64  }
  0x53   : > { %v1395_v18 = vpack.c.bf16 %v539_v15, %v538_v14  ;;  %v1398_v20 = vpack.c.bf16 %v541_v19, %v540_v16  ;;  %v542_v21 = vld [vmem:[%s2014_s4 + $0x20] sm:$0xf]  ;;  %1488 = vset.pattern.permute.xlu0 %v1609_v24  ;;  %s1614_s10 = smov 96   ;;  %s1615_s12 = smov 32   ;;  %v939_v24 = vld [vmem:[%s2016_s6 + $0x18] sm:$0xff]  ;;  %vm1163_vm7 = vcmask 130048  }
  0x54   : > { %376 = vrot.lane.b32.xlu0 %v1781_v6, %s1604_s18  ;;  %v371_v22 = vld [vmem:[%s2013_s3] sm:$0xff]  ;;  %s1618_s19 = smov 16   ;;  %s1181_s25 = sshll.u32 %s1772_s14, 4  ;;  %s1964_s25 = int_to_ptr.vmem [resolvable:$true] %s1181_s25 }
  0x55   : > { %v543_v50 = vld [vmem:[%s2015_s5] sm:$0xff]  ;;  %s1969_s21 = scalar_lea.sflag [#allocation6], %s320_s15  ;;  %s1533_s20 = scalar_lea.vmem %s1964_s25, 256 }
  0x56   : > { %p1534_p12 = scmp.ne.s32.totalorder %s1964_s25, %s1533_s20  ;;  %p2033_p13 = scmp.ne.s32.totalorder %s2024_s16, 0 }
  0x58   : > { %705 = vperm.xlu0 %1488, %v371_v22   ;;  %p1535_p1 = pnand %p1534_p12, %p2033_p13 }
  0x5a   : > { %p1536_p3 = pneg %p1535_p1 }
  0x5c   : > { %1491 = vset.pattern.permute.xlu0 %v1610_v25 }
  0x5d   : > { %697 = vperm.xlu0 %1491, %v371_v22  }
  0x61   : > { %1492 = vset.pattern.permute.xlu0 %v1612_v29 }
  0xc2   : > { %v375_v8 = vpop.permute.xlu0 %374 }
  0xc3   : > { %v381_v10 = vsel %vm380_vm2, %v1790_v7, %v375_v8 }
  0xc4   : > { %1323 = vmatpush3.msra.mxu0 %v381_v10 }
  0xc5   : > { %1325 = vmatmul.mubr.msk.f32.vlgmr.msra.gmra.mrb[0].mxu0 %vm383_vm3, %v1795_v9  ;;  %1394 = vmatprep.subr.bf16.mxu0 %v1607_v17 }
  0xc6   : > { %v377_v12 = vpop.permute.xlu0 %376  ;;  %1342 = vmatprep.mubr.msk.f32.mxu0 %vm1606_vm1, %v1605_v5  ;;  %1396 = vmatpush3.bf16.msra.mxu0 %v1395_v18 }
  0xc7   : > { %v382_v13 = vsel %vm380_vm2, %v1799_v11, %v377_v12  ;;  %1397 = vmatprep.subr.bf16.mxu0 %v1607_v17 }
  0xc8   : > { %1328 = vmatpush3.msra.mxu1 %v382_v13 }
  0xc9   : > { %1330 = vmatmul.mubr.msk.f32.vlgmr.msra.gmra.mrb[0].mxu1 %vm383_vm3, %v1795_v9  ;;  %1400 = vmatprep.subr.bf16.mxu1 %v1607_v17 }
  0xca   : > { %1355 = vmatprep.mubr.msk.f32.mxu1 %vm1606_vm1, %v1605_v5  ;;  %1402 = vmatpush3.bf16.msra.mxu1 %v1395_v18 }
  0xcb   : > { %1403 = vmatprep.subr.bf16.mxu1 %v1607_v17  ;;  %1399 = vmatpush3.bf16.msra.mxu0 %v1398_v20 }
  0xcc   : > { %1340 = vmatprep.subr.mxu0 %v1605_v5 }
  0xce   : > { %1405 = vmatpush3.bf16.msra.mxu1 %v1398_v20  ;;  %v936_v20 = vld [vmem:[%s2016_s6] sm:$0xff] }
  0xcf   : > { %1353 = vmatprep.subr.mxu1 %v1605_v5  ;;  %1341 = vmatpush3.msk.msra.mxu0 %vm548_vm4, %v542_v21 }
  0xd0   : > { %1358 = vmatprep.subr.mxu0 %v1605_v5 }
  0xd2   : > { %1354 = vmatpush3.msk.msra.mxu1 %vm548_vm4, %v542_v21  ;;  %v937_v21 = vld [vmem:[%s2016_s6 + $0x8] sm:$0xff] }
  0xd3   : > { %1363 = vmatprep.subr.mxu1 %v1605_v5  ;;  %v1407_v23 = vpack.c.bf16 %v937_v21, %v936_v20 }
  0xd7   : > { %v1857_v36 = vpop.permute.xlu0 %705 }
  0xdc   : > { %v1869_v48 = vpop.permute.xlu0 %697 }
 0x198   : > { %v1839_v26 = vpop.f32.mrb[0].mxu0 }
 0x199   : > { %529 = vrot.lane.b32.xlu1 %v1839_v26, %s1611_s24  ;;  %v1326_v27 = vpop.f32.mrb[1].mxu0 }
 0x19c   : > { %v1843_v28 = vpop.f32.mrb[0].mxu1 }
 0x19d   : > { %v1331_v30 = vpop.f32.mrb[1].mxu1  ;;  %531 = vrot.lane.b32.xlu1 %v1843_v28, %s1611_s24 }
 0x19e   : > { %v940_v30 = vld [vmem:[%s2016_s6 + $0x20] sm:$0xf] }
 0x1a1   : > { %721 = vperm.xlu1 %1489, %v371_v22  }
 0x1a5   : > { %1490 = vset.pattern.permute.xlu1 %v1612_v29 }
 0x1a6   : > { %737 = vperm.xlu1 %1490, %v371_v22   ;;  %v938_v22 = vld [vmem:[%s2016_s6 + $0x10] sm:$0xff] }
 0x1a7   : > { %v1410_v25 = vpack.c.bf16 %v939_v24, %v938_v22 }
 0x20b   : > { %v530_v31 = vpop.permute.xlu1 %529 }
 0x20c   : > { %v536_v32 = vsel %vm535_vm5, %v381_v10, %v530_v31 }
 0x20d   : > { %1343 = vmatmul.mubr.msk.f32.vlgmr.msra.gmra.mrb[2].mxu0 %vm544_vm6, %v536_v32 }
 0x20e   : > { %1360 = vmatprep.mubr.msk.f32.mxu0 %vm1606_vm1, %v1605_v5 }
 0x20f   : > { %v532_v33 = vpop.permute.xlu1 %531 }
 0x210   : > { %v537_v34 = vsel %vm535_vm5, %v382_v13, %v532_v33 }
 0x211   : > { %1356 = vmatmul.mubr.msk.f32.vlgmr.msra.gmra.mrb[2].mxu1 %vm544_vm6, %v537_v34 }
 0x212   : > { %1365 = vmatprep.mubr.msk.f32.mxu1 %vm1606_vm1, %v1605_v5 }
 0x220   : > { %v1855_v35 = vpop.permute.xlu1 %721 }
 0x225   : > { %v1861_v41 = vpop.permute.xlu1 %737 }
 0x2e0   : > { %v618_v37 = vpop.f32.mrb[2].mxu0 }
 0x2e1   : > { %v1344_v38 = vpop.f32.mrb[3].mxu0  ;;  %v724_v39 = vmul.f32 %v1855_v35, %v618_v37  ;;  %v708_v40 = vmul.f32 %v1857_v36, %v618_v37  ;;  %v740_v44 = vmul.f32 %v1861_v41, %v618_v37  ;;  %v700_v49 = vmul.f32 %v1869_v48, %v618_v37 }
 0x2e3   : > { %728 = vrot.lane.b32.xlu0 %v724_v39, %s1613_s26  ;;  %712 = vrot.lane.b32.xlu1 %v708_v40, %s1614_s10  ;;  %v702_v51 = vadd.f32 %v700_v49, %v543_v50 }
 0x2e4   : > { %v691_v42 = vpop.f32.mrb[2].mxu1 }
 0x2e5   : > { %v1357_v43 = vpop.f32.mrb[3].mxu1  ;;  %v709_v45 = vmul.f32 %v1857_v36, %v691_v42  ;;  %v725_v46 = vmul.f32 %v1855_v35, %v691_v42  ;;  %v741_v47 = vmul.f32 %v1861_v41, %v691_v42  ;;  %v701_v56 = vmul.f32 %v1869_v48, %v691_v42 }
 0x2e7   : > { %744 = vrot.lane.b32.xlu0 %v740_v44, %s1615_s12  ;;  %714 = vrot.lane.b32.xlu1 %v709_v45, %s1614_s10  ;;  %v703_v61 = vadd.f32 %v701_v56, %v543_v50 }
 0x2eb   : > { %730 = vrot.lane.b32.xlu1 %v725_v46, %s1613_s26 }
 0x2ef   : > { %746 = vrot.lane.b32.xlu1 %v741_v47, %s1615_s12 }
 0x355   : > { %v729_v52 = vpop.permute.xlu0 %728  ;;  %v713_v53 = vpop.permute.xlu1 %712 }
 0x356   : > { %v718_v54 = vadd.f32 %v713_v53, %v702_v51  ;;  %v941_v51 = vld [vmem:[%s2017_s7] sm:$0xff] }
 0x358   : > { %v734_v55 = vadd.f32 %v729_v52, %v718_v54 }
 0x359   : > { %v745_v57 = vpop.permute.xlu0 %744  ;;  %v715_v58 = vpop.permute.xlu1 %714 }
 0x35a   : > { %v750_v59 = vadd.f32 %v745_v57, %v734_v55  ;;  %v719_v63 = vadd.f32 %v715_v58, %v703_v61 }
 0x35c   : > { %v1278_v60 = vmul.f32 -1.442695, %v750_v59 }
 0x35d   : > { %v731_v62 = vpop.permute.xlu1 %730 }
 0x35e   : > { %1493 = vpow2.f32 %v1278_v60  ;;  %v735_v0 = vadd.f32 %v731_v62, %v719_v63 }
 0x361   : > { %v747_v1 = vpop.permute.xlu1 %746 }
 0x362   : > { %v751_v2 = vadd.f32 %v747_v1, %v735_v0 }
 0x364   : > { %v1279_v3 = vmul.f32 -1.442695, %v751_v2 }
 0x366   : > { %1495 = vpow2.f32 %v1279_v3 }
 0x368   : > { %v1494_v8 = vpop.eup %1493 }
 0x369   : > { %v758_v10 = vadd.f32 1.0, %v1494_v8 }
 0x36b   : > { %1497 = vrcp.f32 %v758_v10 }
 0x370   : > { %v1496_v12 = vpop.eup %1495 }
 0x371   : > { %v759_v13 = vadd.f32 1.0, %v1496_v12 }
 0x373   : > { %1499 = vrcp.f32 %v759_v13 }
 0x375   : > { %v1876_v14 = vpop.eup %1497 }
 0x376   : > { %v764_v15 = vmul.f32 %v1876_v14, %v1776_v4  ;;  %v1141_v2 = vsub.f32 1.0, %v1876_v14 }
 0x378   : > { %1359 = vmatpush3.msra.mxu0 %v764_v15 }
 0x379   : > { %1361 = vmatmul.mubr.msk.f32.vlgmr.msra.gmra.mrb[4].mxu0 %vm383_vm3, %v1795_v9  ;;  %1406 = vmatprep.subr.bf16.mxu0 %v1607_v17 }
 0x37a   : > { %1378 = vmatprep.mubr.msk.f32.mxu0 %vm1606_vm1, %v1605_v5  ;;  %1408 = vmatpush3.bf16.msra.mxu0 %v1407_v23 }
 0x37b   : > { %1409 = vmatprep.subr.bf16.mxu0 %v1607_v17 }
 0x37d   : > { %v1885_v16 = vpop.eup %1499 }
 0x37e   : > { %v765_v18 = vmul.f32 %v1885_v16, %v1781_v6  ;;  %1411 = vmatpush3.bf16.msra.mxu0 %v1410_v25  ;;  %v1142_v13 = vsub.f32 1.0, %v1885_v16 }
 0x37f   : > { %1376 = vmatprep.subr.mxu0 %v1605_v5 }
 0x380   : > { %1364 = vmatpush3.msra.mxu1 %v765_v18 }
 0x381   : > { %1366 = vmatmul.mubr.msk.f32.vlgmr.msra.gmra.mrb[4].mxu1 %vm383_vm3, %v1795_v9  ;;  %1412 = vmatprep.subr.bf16.mxu1 %v1607_v17 }
 0x382   : > { %1391 = vmatprep.mubr.msk.f32.mxu1 %vm1606_vm1, %v1605_v5  ;;  %1414 = vmatpush3.bf16.msra.mxu1 %v1407_v23 }
 0x383   : > { %1415 = vmatprep.subr.bf16.mxu1 %v1607_v17  ;;  %1377 = vmatpush3.msk.msra.mxu0 %vm548_vm4, %v940_v30 }
 0x386   : > { %1417 = vmatpush3.bf16.msra.mxu1 %v1410_v25 }
 0x387   : > { %1389 = vmatprep.subr.mxu1 %v1605_v5 }
 0x38a   : > { %1390 = vmatpush3.msk.msra.mxu1 %vm548_vm4, %v940_v30 }
 0x44c   : > { %v832_v19 = vpop.f32.mrb[4].mxu0 }
 0x44d   : > { %918 = vrot.lane.b32.xlu0 %v832_v19, %s1604_s18  ;;  %v1362_v9 = vpop.f32.mrb[5].mxu0 }
 0x451   : > { %908 = vrot.lane.b32.xlu0 %v764_v15, %s1604_s18 }
 0x454   : > { %v902_v27 = vpop.f32.mrb[4].mxu1 }
 0x455   : > { %920 = vrot.lane.b32.xlu1 %v902_v27, %s1604_s18  ;;  %v1367_v29 = vpop.f32.mrb[5].mxu1 }
 0x459   : > { %910 = vrot.lane.b32.xlu1 %v765_v18, %s1604_s18  ;;  %s1616_s18 = smov 112  }
 0x4bf   : > { %v919_v17 = vpop.permute.xlu0 %918 }
 0x4c0   : > { %v924_v31 = vsel %vm380_vm2, %v1839_v26, %v919_v17 }
 0x4c1   : > { %928 = vrot.lane.b32.xlu0 %v924_v31, %s1611_s24 }
 0x4c3   : > { %v909_v33 = vpop.permute.xlu0 %908 }
 0x4c4   : > { %v914_v34 = vsel %vm380_vm2, %v1790_v7, %v909_v33 }
 0x4c7   : > { %v921_v5 = vpop.permute.xlu1 %920 }
 0x4c8   : > { %v925_v32 = vsel %vm380_vm2, %v1843_v28, %v921_v5 }
 0x4c9   : > { %930 = vrot.lane.b32.xlu1 %v925_v32, %s1611_s24  ;;  %s1617_s24 = smov 80  }
 0x4cb   : > { %v911_v39 = vpop.permute.xlu1 %910 }
 0x4cc   : > { %v915_v26 = vsel %vm380_vm2, %v1799_v11, %v911_v39 }
 0x533   : > { %v929_v37 = vpop.permute.xlu0 %928 }
 0x534   : > { %v934_v38 = vsel %vm535_vm5, %v914_v34, %v929_v37 }
 0x535   : > { %1379 = vmatmul.mubr.msk.f32.vlgmr.msra.gmra.mrb[6].mxu0 %vm544_vm6, %v934_v38 }
 0x53b   : > { %v931_v40 = vpop.permute.xlu1 %930 }
 0x53c   : > { %v935_v42 = vsel %vm535_vm5, %v915_v26, %v931_v40 }
 0x53d   : > { %1392 = vmatmul.mubr.msk.f32.vlgmr.msra.gmra.mrb[6].mxu1 %vm544_vm6, %v935_v42 }
 0x608   : > { %v1014_v28 = vpop.f32.mrb[6].mxu0 }
 0x609   : > { %v1380_v43 = vpop.f32.mrb[7].mxu0  ;;  %v1095_v44 = vmul.f32 %v1014_v28, %v1857_v36  ;;  %v1107_v7 = vmul.f32 %v1014_v28, %v1855_v35  ;;  %v1119_v47 = vmul.f32 %v1014_v28, %v1861_v41 }
 0x60b   : > { %1099 = vrot.lane.b32.xlu0 %v1095_v44, %s1616_s18 }
 0x60f   : > { %1111 = vrot.lane.b32.xlu0 %v1107_v7, %s1614_s10 }
 0x610   : > { %v1087_v45 = vpop.f32.mrb[6].mxu1 }
 0x611   : > { %v1393_v46 = vpop.f32.mrb[7].mxu1  ;;  %v1096_v11 = vmul.f32 %v1087_v45, %v1857_v36  ;;  %v1108_v49 = vmul.f32 %v1087_v45, %v1855_v35  ;;  %v1120_v50 = vmul.f32 %v1087_v45, %v1861_v41  ;;  %v1091_v36 = vmul.f32 %v1014_v28, %v1869_v48 }
 0x612   : > { %v1092_v56 = vmul.f32 %v1087_v45, %v1869_v48 }
 0x613   : > { %1101 = vrot.lane.b32.xlu1 %v1096_v11, %s1616_s18  ;;  %1123 = vrot.lane.b32.xlu0 %v1119_v47, %s1617_s24  ;;  %v1093_v53 = vadd.f32 %v1091_v36, %v941_v51 }
 0x614   : > { %v1094_v41 = vadd.f32 %v1092_v56, %v941_v51 }
 0x617   : > { %1113 = vrot.lane.b32.xlu1 %v1108_v49, %s1614_s10  ;;  %1133 = vrot.lane.b32.xlu0 %v1776_v4, %s1618_s19  ;;  %s1287_s10 = sshll.u32 %s1689_s9, 7  ;;  %s1619_s9 = smov [#allocation7]  }
 0x618   : > { %s1962_s13 = scalar_lea.hbm %s2018_s8, %s1287_s10 }
 0x61b   : > { %1125 = vrot.lane.b32.xlu1 %v1120_v50, %s1617_s24 }
 0x61f   : > { %1135 = vrot.lane.b32.xlu1 %v1781_v6, %s1618_s19 }
 0x67d   : > { %v1100_v52 = vpop.permute.xlu0 %1099 }
 0x67e   : > { %v1105_v35 = vadd.f32 %v1100_v52, %v1093_v53 }
 0x681   : > { %v1112_v54 = vpop.permute.xlu0 %1111 }
 0x682   : > { %v1117_v55 = vadd.f32 %v1112_v54, %v1105_v35 }
 0x685   : > { %v1102_v57 = vpop.permute.xlu1 %1101  ;;  %v1124_v4 = vpop.permute.xlu0 %1123 }
 0x686   : > { %v1129_v58 = vadd.f32 %v1124_v4, %v1117_v55  ;;  %v1106_v6 = vadd.f32 %v1102_v57, %v1094_v41 }
 0x688   : > { %1501 = vtanh.f32 %v1129_v58 }
 0x689   : > { %v1114_v59 = vpop.permute.xlu1 %1113  ;;  %v1134_v1 = vpop.permute.xlu0 %1133 }
 0x68a   : > { %v1118_v60 = vadd.f32 %v1114_v59, %v1106_v6  ;;  %v1139_v3 = vmul.f32 %v1876_v14, %v1134_v1 }
 0x68d   : > { %v1126_v61 = vpop.permute.xlu1 %1125 }
 0x68e   : > { %v1130_v62 = vadd.f32 %v1126_v61, %v1118_v60 }
 0x690   : > { %1503 = vtanh.f32 %v1130_v62 }
 0x691   : > { %v1136_v12 = vpop.permute.xlu1 %1135 }
 0x692   : > { %v1502_v63 = vpop.eup %1501  ;;  %v1140_v18 = vmul.f32 %v1885_v16, %v1136_v12 }
 0x693   : > { %1145 = vrot.lane.b32.xlu0 %v1502_v63, %s1618_s19 }
 0x69a   : > { %v1504_v0 = vpop.eup %1503 }
 0x69b   : > { %1147 = vrot.lane.b32.xlu1 %v1504_v0, %s1618_s19 }
 0x705   : > { %v1146_v48 = vpop.permute.xlu0 %1145 }
 0x706   : > { %v1151_v8 = vmul.f32 %v1146_v48, %v1141_v2 }
 0x708   : > { %v1153_v10 = vadd.f32 %v1151_v8, %v1139_v3 }
 0x70a   : > { %1157 = vrot.lane.b32.xlu0 %v1153_v10, %s1616_s18 }
 0x70d   : > { %v1148_v15 = vpop.permute.xlu1 %1147 }
 0x70e   : > { %v1152_v19 = vmul.f32 %v1148_v15, %v1142_v13 }
 0x710   : > { %v1154_v20 = vadd.f32 %v1152_v19, %v1140_v18 }
 0x712   : > { %1159 = vrot.lane.b32.xlu1 %v1154_v20, %s1616_s18  ;;  %s1537_s18 = sshll.u32 %s1619_s9, 4  ;;  %s1538_s18 = int_to_ptr.vmem [resolvable:$false] %s1537_s18 }
 0x713   : > { %s1539_s24 = scalar_lea.vmem %s1538_s18, 512  ;;  %p1540_p7 = scmp.lt.s32.totalorder %s1964_s25, %s1538_s18 }
 0x714   : > { %p1541_p8 = scmp.lt.s32.totalorder %s1539_s24, %s1533_s20 }
 0x716   : > { %p1542_p9 = por %p1541_p8, %p1540_p7 }
 0x718   : > { %p1543_p0 = pnand %p1542_p9, %p1536_p3 }
 0x77c   : > { %v1158_v14 = vpop.permute.xlu0 %1157 }
 0x77d   : > { %1164 = vst.msk [vmem:[#allocation2] sm:$0xff] %vm1163_vm7, %v1158_v14  ;;  %1166 = vst.msk [vmem:[%s1772_s14] sm:$0xff] %vm1163_vm7, %v1158_v14 }
 0x784   : > { %v1160_v16 = vpop.permute.xlu1 %1159 }
 0x785   : > { %1165 = vst.msk [vmem:[#allocation2 + $0x8] sm:$0xff] %vm1163_vm7, %v1160_v16  ;;  %1167 = vst.msk [vmem:[%s1772_s14 + $0x8] sm:$0xff] %vm1163_vm7, %v1160_v16 }
 0x786   : > { %1546 = shalt.err (!%p1543_p0)
}
 0x787   : > { %s1547_s15 = scalar_lea.hbm %s1962_s13, 256  ;;  %s1551_s22 = scalar_lea.hbm %s2018_s8, 1024 }
 0x788   : > { %p1548_p2 = scmp.ne.s32.totalorder %s1962_s13, %s1547_s15  ;;  %p1552_p6 = scmp.lt.u32.totalorder %s1962_s13, %s2018_s8 }
 0x789   : > { %p1553_p10 = scmp.lt.u32.totalorder %s1551_s22, %s1547_s15  ;;  %p1555_p12 = scmp.lt.u32.totalorder %s1547_s15, %s1962_s13 }
 0x78a   : > { %p1549_p4 = pnand %p1548_p2, %p2033_p13 }
 0x78b   : > { %p1554_p11 = por %p1553_p10, %p1552_p6 }
 0x78c   : > { %p1550_p5 = pneg %p1549_p4 }
 0x78d   : > { %p1556_p1 = por %p1555_p12, %p1554_p11 }
 0x78f   : > { %p1557_p3 = pnand %p1556_p1, %p1550_p5 }
 0x791   : > { %1560 = shalt.err (!%p1557_p3)
}
 0x792   : > { %s1620_s26 = smov 128   ;;  %s1621_s12 = smov 512  }
 0x793   : > { %s1622_s20 = smov 8  }
 0x794   : > { %1422 = dma.vmem_to_hbm [thread:$0]  (%p2033_p13), %s1964_s25, 256, %s1962_s13, %s1969_s21, %s1620_s26, %s1621_s12, %s1622_s20  }
 0x795 PF: > { %p1434_p7 = scmp.ge.s32.totalorder %s1599_s30, 2  ;;  %s1196_s9 = sand.u32 1, %s1587_s27  }
 0x796   : > { %p2034_p8 = scmp.ne.s32.totalorder %s2025_s17, 0  ;;  %s1197_s18 = scalar_lea.sflag [#allocation6], %s1196_s9 }
 0x798   : > { %p1429_p9 = pnand %p1434_p7, %p2034_p8 }
 0x79a   : > { %1582 = dma.done.wait (!%p1429_p9), %s1197_s18, 256  }
 0x79b   : > { %1584 = vsyncadd (!%p1429_p9), %s1197_s18, 4294967040  ;;  %s2035_s24 = sld [smem:[#allocation10_spill]]  ;;  %p19_p0 = scmp.ge.s32.totalorder %s1693_s11, 6  }
 0x79c   : > { %s2036_s27 = smov %s1591_s28  ;;  %s2037_s28 = smov %s1595_s29 }
 0x79d   : > { %s2039_s30 = smov %s1693_s11  ;;  %21 = sbr.rel (!%p19_p0) target bundleno = 4 (0x4), region = 139 }
 0x7a1   : > { %s2038_s29 = smov %s2035_s24 }
 0x7a4   :  { %1202 = vsyncpa [#allocation5], 1 }
 0x7a5   :  { %1204 = vsyncpa [#allocation5 + $0x1], 1 }
 0x7a6   :  { %1205 = vsyncpa [#allocation6], 1 }
 0x7a7   :  { %1207 = vsyncpa [#allocation6 + $0x1], 1 }

</bundles_post_ra>
